<compile_context>
chip_gen: v6e
topology: v6e:2x2x1
jax: 0.10.0
libtpu: 0.0.40
codegen_flags: <defaults>
</compile_context>

<pallas_src>
import functools

import jax
import jax.numpy as jnp
from jax.experimental import pallas as pl
from jax.experimental.pallas import tpu as pltpu

INPUT_SIZE = 8
ACTION_SIZE = 2
IN_F = INPUT_SIZE + ACTION_SIZE   # 10
H1 = 200
H2 = 100
OUT_F = 1


def _round_up(n, m):
    return ((n + m - 1) // m) * m


def critic_kernel(x_ref, w_ref, b_ref, o_ref):
    # x_ref: [TM, IN_F] f32, w_ref: [1, IN_F] f32, b_ref: [1, 1] f32
    x = x_ref[...]
    w = w_ref[...]
    # [TM, IN_F] * [1, IN_F] -> lane-reduce -> [TM, 1]
    o_ref[...] = jnp.sum(x * w, axis=1, keepdims=True) + b_ref[...]


def prepare_params(params):
    """Collapse the activation-free 3-layer MLP into one affine map (f32).

    Exact in real arithmetic; numerically it stays in float32 end-to-end,
    closer to the PyTorch model than chained low-precision layers.
    """
    w1, b1 = params["w1"], params["b1"]   # (10,200), (1,200)
    w2, b2 = params["w2"], params["b2"]   # (200,100), (1,100)
    w3, b3 = params["w3"], params["b3"]   # (100,1),  (1,1)

    w = w1 @ w2 @ w3                                   # (10, 1)
    b = b1 @ w2 @ w3 + b2 @ w3 + b3                    # (1, 1)
    return dict(
        w=jnp.asarray(w, jnp.float32).T,               # (1, 10): row vector for broadcast
        b=jnp.asarray(b, jnp.float32),                 # (1, 1)
    )


def _choose_tm(B, block_m):
    tm_full = _round_up(B, 8)
    if tm_full <= block_m:
        # Batch fits under the cap.  For bigger batches still force >= 2 tiles
        # so the parallel grid axis can span both TensorCores on v7x.
        if B > 512:
            return _round_up(-(-B // 2), 8)
        return tm_full
    return block_m


@functools.partial(jax.jit, static_argnames=("block_m",))
def critic_forward(x, prepared, block_m=4096):
    """x: [B, IN_F] float32. prepared: output of prepare_params()."""
    B = x.shape[0]
    tm = _choose_tm(B, block_m)
    grid = (pl.cdiv(B, tm),)

    x_spec = pl.BlockSpec((tm, IN_F), lambda i: (i, 0))
    # Collapsed weight/bias: constant block index -> resident in VMEM.
    w_spec = pl.BlockSpec((1, IN_F), lambda i: (0, 0))
    b_spec = pl.BlockSpec((1, 1), lambda i: (0, 0))
    out_spec = pl.BlockSpec((tm, 1), lambda i: (i, 0))

    bytes_accessed = B * IN_F * 4 + B * 4 + (IN_F + 1) * 4
    cost = pl.CostEstimate(flops=2 * B * IN_F,
                           transcendentals=0,
                           bytes_accessed=bytes_accessed)

    return pl.pallas_call(
        critic_kernel,
        out_shape=jax.ShapeDtypeStruct((B, OUT_F), jnp.float32),
        grid=grid,
        in_specs=[x_spec, w_spec, b_spec],
        out_specs=out_spec,
        compiler_params=pltpu.CompilerParams(
            dimension_semantics=("parallel",),   # shard batch tiles across TCs (v7x)
        ),
        cost_estimate=cost,
    )(x.astype(jnp.float32), prepared["w"], prepared["b"])


def init_params(key):
    """Mimics nn.Linear's uniform(-1/sqrt(fan_in), 1/sqrt(fan_in)) init."""
    keys = jax.random.split(key, 6)

    def linear(kw, kb, fan_in, fan_out):
        bound = 1.0 / jnp.sqrt(fan_in)
        w = jax.random.uniform(kw, (fan_in, fan_out), jnp.float32, -bound, bound)
        b = jax.random.uniform(kb, (1, fan_out), jnp.float32, -bound, bound)
        return w, b

    w1, b1 = linear(keys[0], keys[1], IN_F, H1)
    w2, b2 = linear(keys[2], keys[3], H1, H2)
    w3, b3 = linear(keys[4], keys[5], H2, OUT_F)
    return dict(w1=w1, b1=b1, w2=w2, b2=b2, w3=w3, b3=b3)


def critic_ref(x, params):
    """Per-layer float32 reference (matches the PyTorch forward)."""
    h1 = x @ params["w1"] + params["b1"]
    h2 = h1 @ params["w2"] + params["b2"]
    return h2 @ params["w3"] + params["b3"]


if __name__ == "__main__":
    key = jax.random.PRNGKey(0)
    k_x, k_p = jax.random.split(key)

    B = 8
    x = jax.random.normal(k_x, (B, IN_F), dtype=jnp.float32)
    params = init_params(k_p)
    prepared = prepare_params(params)

    out = critic_forward(x, prepared)
    out = jax.block_until_ready(out)

    ref = critic_ref(x, params)
    assert out.shape == (B, OUT_F), out.shape
    assert jnp.allclose(out, ref, atol=1e-4, rtol=1e-4), \
        f"max err {jnp.max(jnp.abs(out - ref))}"

    print("KERNEL_OK")
</pallas_src>

<mosaic_0001>
module attributes {stable_mosaic.version = 11 : i64} {
  func.func @critic_kernel(%arg0: i32, %arg1: memref<8x10xf32, #tpu.memory_space<vmem>>, %arg2: memref<1x10xf32, #tpu.memory_space<vmem>>, %arg3: memref<1x1xf32, #tpu.memory_space<vmem>>, %arg4: memref<8x1xf32, #tpu.memory_space<vmem>>) attributes {dimension_semantics = [#tpu.dimension_semantics<parallel>], iteration_bounds = array<i64: 1>, scalar_prefetch = 0 : i64, scratch_operands = 0 : i64, tpu.core_type = #tpu.core_type<tc>, window_params = [{transform_indices = @transform_0, window_bounds = array<i64: 8, 10>}, {pipeline_mode = #tpu.pipeline_mode<synchronous>, transform_indices = @transform_1, window_bounds = array<i64: 1, 10>}, {pipeline_mode = #tpu.pipeline_mode<synchronous>, transform_indices = @transform_2, window_bounds = array<i64: 1, 1>}, {transform_indices = @transform_3, window_bounds = array<i64: 8, 1>}]} {
    %c0 = arith.constant 0 : index
    %c0_0 = arith.constant 0 : index
    %0 = vector.load %arg1[%c0, %c0_0] : memref<8x10xf32, #tpu.memory_space<vmem>>, vector<8x10xf32>
    %c0_1 = arith.constant 0 : index
    %c0_2 = arith.constant 0 : index
    %1 = vector.load %arg2[%c0_1, %c0_2] : memref<1x10xf32, #tpu.memory_space<vmem>>, vector<1x10xf32>
    %2 = vector.broadcast %1 : vector<1x10xf32> to vector<8x10xf32>
    %3 = arith.mulf %0, %2 : vector<8x10xf32>
    %cst = arith.constant dense<0.000000e+00> : vector<8xf32>
    %4 = vector.multi_reduction <add>, %3, %cst [1] : vector<8x10xf32> to vector<8xf32>
    %5 = vector.shape_cast %4 : vector<8xf32> to vector<8x1xf32>
    %c0_3 = arith.constant 0 : index
    %c0_4 = arith.constant 0 : index
    %6 = vector.load %arg3[%c0_3, %c0_4] : memref<1x1xf32, #tpu.memory_space<vmem>>, vector<1x1xf32>
    %7 = vector.broadcast %6 : vector<1x1xf32> to vector<8x1xf32>
    %8 = arith.addf %5, %7 : vector<8x1xf32>
    %c0_5 = arith.constant 0 : index
    %c0_6 = arith.constant 0 : index
    %9 = vector.load %arg4[%c0_5, %c0_6] : memref<8x1xf32, #tpu.memory_space<vmem>>, vector<8x1xf32>
    tpu.vector_store %arg4[%c0_5, %c0_6], %8 {strides = array<i32>} : memref<8x1xf32, #tpu.memory_space<vmem>>, vector<8x1xf32>,
    return
  }
  func.func @transform_0(%arg0: i32) -> (i32, i32) {
    %c0_i32 = arith.constant 0 : i32
    %c0_i32_0 = arith.constant 0 : i32
    return %arg0, %c0_i32 : i32, i32
  }
  func.func @transform_1(%arg0: i32) -> (i32, i32) {
    %c0_i32 = arith.constant 0 : i32
    %c0_i32_0 = arith.constant 0 : i32
    %c0_i32_1 = arith.constant 0 : i32
    return %c0_i32, %c0_i32_0 : i32, i32
  }
  func.func @transform_2(%arg0: i32) -> (i32, i32) {
    %c0_i32 = arith.constant 0 : i32
    %c0_i32_0 = arith.constant 0 : i32
    %c0_i32_1 = arith.constant 0 : i32
    return %c0_i32, %c0_i32_0 : i32, i32
  }
  func.func @transform_3(%arg0: i32) -> (i32, i32) {
    %c0_i32 = arith.constant 0 : i32
    %c0_i32_0 = arith.constant 0 : i32
    return %arg0, %c0_i32 : i32, i32
  }
}

</mosaic_0001>

<bundles_post_ra>
// kernel: critic_forward.1
= control target key start
LH: loop header
LB: loop body
LE: loop exit
PB: predicated region body
PF: predicated region fallthrough
CT: control target
= control target key end

     0   :  { %s114_s0 = inlined_call_operand.hbm [shape: f32[8,10], index: 0, kind: input, shape index: {}]   ;;  %s115_s1 = inlined_call_operand.vmem [shape: f32[1,10], index: 1, kind: input, shape index: {}]   ;;  %s116_s2 = inlined_call_operand.<no memory space> [shape: f32[1,1], index: 2, kind: input, shape index: {}]   ;;  %s117_s3 = inlined_call_operand.vmem [shape: f32[8,1], index: 3, kind: output, shape index: {}]  }
   0x1   :  { %v8_v0 = vstv %s116_s2 }
   0x2   :  { %9 = vst [vmem:[#allocation2] sm:$0x1] %v8_v0 }
   0x3   :  { %10 = vsyncpa [#allocation4], 0  ;;  %s81_s14 = smov [#allocation3]  }
   0x4   :  { %s17_s15 = sshll.u32 %s81_s14, 4  ;;  %s18_s15 = int_to_ptr.vmem [resolvable:$true] %s17_s15 }
   0x5   :  { %s67_s16 = scalar_lea.vmem %s18_s15, 128  ;;  %p72_p1 = scmp.lt.s32.totalorder %s18_s15, %s18_s15 }
   0x6   :  { %p68_p0 = scmp.ne.s32.totalorder %s18_s15, %s67_s16  ;;  %p73_p2 = scmp.lt.s32.totalorder %s67_s16, %s67_s16 }
   0x8   :  { %p74_p3 = por %p73_p2, %p72_p1 }
   0xa   :  { %p75_p4 = pnand %p74_p3, %p68_p0 }
   0xc   :  { %78 = shalt.err (!%p75_p4)
}
   0xd   :  { %20 = dma.hbm_to_vmem [thread:$0]  %s114_s0, 128, %s18_s15, [#allocation4]  }
   0xe   :  { %79 = dma.done.wait [#allocation4], 128  }
   0xf   :  { %80 = vsyncadd [#allocation4], 4294967168  ;;  %v28_v1 = vld [vmem:[#allocation3] sm:$0xff]  ;;  %v56_v2 = vld [vmem:[%s115_s1] ss:$0 sm:$0xff]  ;;  %vm37_vm0 = vcmask 80896  }
  0x10   :  { %v36_v3 = vmul.f32 %v56_v2, %v28_v1  ;;  %v57_v5 = vld [vmem:[#allocation2] ss:$0 sm:$0xff]  ;;  %vm49_vm1 = vcmask 7168  }
  0x12   :  { %v38_v4 = vsel %vm37_vm0, %v36_v3, 0.0 }
  0x13   :  { %39 = vadd.xlane.f32.xlu0 %v38_v4 }
  0x9c   :  { %v40_v6 = vpop.xlane.xlu0 %39 }
  0x9d   :  { %v48_v7 = vadd.f32 %v57_v5, %v40_v6 }
  0x9f   :  { %50 = vst.msk [vmem:[%s117_s3] sm:$0xff] %vm49_vm1, %v48_v7 }
  0xa0   :  { %55 = vsyncpa [#allocation4], 1 }

</bundles_post_ra>
